<compile_context>
chip_gen: v7x
topology: tpu7x:2x2x1
jax: 0.10.0
libtpu: 0.0.40
codegen_flags: <defaults>
</compile_context>

<pallas_src>
import math

import jax
import jax.numpy as jnp
from jax.experimental import pallas as pl
from jax.experimental.pallas import tpu as pltpu


_SUBLANE = 32                    # sublane rounding multiple (covers f32/bf16/int8 packing)
_MIN_SPLIT_BYTES = 512 * 1024    # only force a >=2-step grid when there is real work
_budget_cache = None


def _vmem_budget():
    """Returns (vmem_limit_bytes, per-buffer block byte target) for this TPU generation."""
    global _budget_cache
    if _budget_cache is None:
        try:
            cap = int(pltpu.get_tpu_info().vmem_capacity_bytes)
        except Exception:
            cap = 64 * 1024 * 1024                     # conservative (v7x-sized) fallback
        vmem_limit = min(cap // 2, 64 * 1024 * 1024)   # 64 MiB on v5e/v6e, 32 MiB on v7x
        # 3 streams (x, pe, out) x 2 buffers = 6 live blocks; keep ~25% headroom.
        block_bytes = min(8 * 1024 * 1024, max(2 * 1024 * 1024, vmem_limit // 8))
        _budget_cache = (vmem_limit, block_bytes)
    return _budget_cache


def create_positional_encoding(d_model: int, max_len: int = 5000) -> jnp.ndarray:
    """Deterministic parameter setup, identical math to the PyTorch __init__."""
    position = jnp.arange(0, max_len, dtype=jnp.float32)[:, None]            # (max_len, 1)
    div_term = jnp.exp(
        jnp.arange(0, d_model, 2, dtype=jnp.float32) * (-math.log(10000.0) / d_model)
    )
    pe = jnp.zeros((1, max_len, d_model), dtype=jnp.float32)
    pe = pe.at[0, :, 0::2].set(jnp.sin(position * div_term))
    # Canonical PyTorch module only supports even d_model; slicing keeps odd d_model working.
    pe = pe.at[0, :, 1::2].set(jnp.cos(position * div_term[: d_model // 2]))
    return pe


def _add_pe_kernel(x_ref, pe_ref, o_ref):
    # pe stays f32; the mixed-dtype add promotes to f32, then one cast to the output dtype.
    # Works for 3-D blocks (B_blk, ts, D)+(1, ts, D) and 2-D blocks (tb, tc)+(1, tc).
    o_ref[...] = (x_ref[...] + pe_ref[...]).astype(o_ref.dtype)


def _cost(B, S, D, itemsize):
    # x read + out write in activation dtype, one pass over the f32 PE slab.
    return pl.CostEstimate(
        flops=B * S * D,
        transcendentals=0,
        bytes_accessed=2 * B * S * D * itemsize + S * D * 4,
    )


def _round_tile(n, full):
    """Sequence-tile length: a multiple of 32 when tiling, or the full extent
    rounded up to a multiple of 8 when a single block suffices (satisfies the
    (8,128) block constraint for both x and the larger PE table)."""
    if n >= full:
        return max(8, ((full + 7) // 8) * 8)
    return max(_SUBLANE, (n // _SUBLANE) * _SUBLANE)


def _split_for_two_cores(ts, full, total_bytes):
    """If the whole extent fits one block but the work is large, split it so a
    parallel grid axis exposes >=2 steps (both v7x TensorCores participate)."""
    if ts < full or total_bytes < _MIN_SPLIT_BYTES or full < 2 * _SUBLANE:
        return ts
    half = ((full + 1) // 2 + _SUBLANE - 1) // _SUBLANE * _SUBLANE
    return min(half, full)


def positional_encoding_forward(x: jnp.ndarray, pe_table: jnp.ndarray,
                                *, pe_flat_cache=None) -> jnp.ndarray:
    """x: (B, S, D);  pe_table: (1, max_len, D) float32."""
    B, S, D = x.shape
    max_len = pe_table.shape[1]
    if S > max_len:
        raise ValueError(f"seq_len {S} exceeds positional-encoding max_len {max_len}")
    if pe_table.shape[2] != D:
        raise ValueError(f"d_model mismatch: x has {D}, pe_table has {pe_table.shape[2]}")

    itemsize = jnp.dtype(x.dtype).itemsize
    vmem_limit, block_bytes = _vmem_budget()
    cost = _cost(B, S, D, itemsize)
    out_bytes = B * S * D * itemsize

    # ---- Path A: D already lane-dense (multiple of 128): tile the sequence axis. ----
    # The full f32 pe_table goes in untouched; the pe index_map slices rows [s*ts, s*ts+ts),
    # which are always valid block indices of the (larger) table.  Any padded tail rows of
    # a partial block only affect output rows >= S, which are masked on store.
    if D % 128 == 0:
        if B <= 8:
            # Fold the whole batch into one block; grid only over sequence.
            ts = _round_tile(max(1, block_bytes // max(1, B * D * itemsize)), S)
            ts = _split_for_two_cores(ts, S, out_bytes)
            ns = pl.cdiv(S, ts)
            return pl.pallas_call(
                _add_pe_kernel,
                out_shape=jax.ShapeDtypeStruct((B, S, D), x.dtype),
                grid=(ns,),
                in_specs=[
                    pl.BlockSpec((B, ts, D), lambda s: (0, s, 0)),
                    pl.BlockSpec((1, ts, D), lambda s: (0, s, 0)),
                ],
                out_specs=pl.BlockSpec((B, ts, D), lambda s: (0, s, 0)),
                compiler_params=pltpu.CompilerParams(
                    dimension_semantics=("parallel",),
                    vmem_limit_bytes=vmem_limit,
                ),
                cost_estimate=cost,
            )(x, pe_table)

        # Larger batches: seq blocks outer, batch inner -> PE tile reused across batch.
        ts = _round_tile(max(1, block_bytes // max(1, D * itemsize)), S)
        ns = pl.cdiv(S, ts)
        return pl.pallas_call(
            _add_pe_kernel,
            out_shape=jax.ShapeDtypeStruct((B, S, D), x.dtype),
            grid=(ns, B),
            in_specs=[
                pl.BlockSpec((1, ts, D), lambda s, b: (b, s, 0)),
                pl.BlockSpec((1, ts, D), lambda s, b: (0, s, 0)),
            ],
            out_specs=pl.BlockSpec((1, ts, D), lambda s, b: (b, s, 0)),
            compiler_params=pltpu.CompilerParams(
                dimension_semantics=("parallel", "parallel"),
                vmem_limit_bytes=vmem_limit,
            ),
            cost_estimate=cost,
        )(x, pe_table)

    # ---- Path B: small/odd D with S*D a multiple of 128: flatten (S, D) so the lane
    #      axis is lane-dense (avoids masked partial stores for tiny D). ----
    SD = S * D
    if SD % 128 == 0:
        concrete = not isinstance(pe_table, jax.core.Tracer)
        if pe_flat_cache is not None and concrete and S in pe_flat_cache:
            pe2 = pe_flat_cache[S]
        else:
            pe2 = pe_table[:, :S, :].reshape(1, SD)     # f32; one-time copy if S < max_len
            if pe_flat_cache is not None and concrete:
                pe_flat_cache[S] = pe2
        x2 = x.reshape(B, SD)                           # bitcast for contiguous x
        tb = min(B, 256)
        tc = (block_bytes // max(1, tb * itemsize)) // 128 * 128
        tc = min(SD, max(128, tc))
        if tc >= SD and tb >= B and out_bytes >= _MIN_SPLIT_BYTES and SD >= 256:
            tc = ((SD // 2 + 127) // 128) * 128         # >=2 parallel steps for v7x
        out2 = pl.pallas_call(
            _add_pe_kernel,
            out_shape=jax.ShapeDtypeStruct((B, SD), x.dtype),
            grid=(pl.cdiv(SD, tc), pl.cdiv(B, tb)),     # col blocks outer, row blocks inner
            in_specs=[
                pl.BlockSpec((tb, tc), lambda c, r: (r, c)),
                pl.BlockSpec((1, tc), lambda c, r: (0, c)),
            ],
            out_specs=pl.BlockSpec((tb, tc), lambda c, r: (r, c)),
            compiler_params=pltpu.CompilerParams(
                dimension_semantics=("parallel", "parallel"),
                vmem_limit_bytes=vmem_limit,
            ),
            cost_estimate=cost,
        )(x2, pe2)
        return out2.reshape(B, S, D)

    # ---- Path C: no lane-dense factorization; tile the sequence axis with the full
    #      (ragged) D as the block's last dim so VMEM stays bounded for large S. ----
    ts = _round_tile(max(1, block_bytes // max(1, D * itemsize)), S)
    ns = pl.cdiv(S, ts)
    return pl.pallas_call(
        _add_pe_kernel,
        out_shape=jax.ShapeDtypeStruct((B, S, D), x.dtype),
        grid=(ns, B),
        in_specs=[
            pl.BlockSpec((1, ts, D), lambda s, b: (b, s, 0)),
            pl.BlockSpec((1, ts, D), lambda s, b: (0, s, 0)),
        ],
        out_specs=pl.BlockSpec((1, ts, D), lambda s, b: (b, s, 0)),
        compiler_params=pltpu.CompilerParams(
            dimension_semantics=("parallel", "parallel"),
            vmem_limit_bytes=vmem_limit,
        ),
        cost_estimate=cost,
    )(x, pe_table)


class PositionalEncoding:
    """JAX/Pallas counterpart of the PyTorch module."""

    def __init__(self, d_model: int, max_len: int = 5000):
        self.positional_encoding = create_positional_encoding(d_model, max_len)
        self._pe_flat_cache = {}   # seq_len -> flattened f32 PE slab (Path B only)

    def __call__(self, x: jnp.ndarray) -> jnp.ndarray:
        return positional_encoding_forward(x, self.positional_encoding,
                                           pe_flat_cache=self._pe_flat_cache)


def reference_forward(x: jnp.ndarray, pe_table: jnp.ndarray) -> jnp.ndarray:
    # f32 accumulation, one rounding to the activation dtype (same as the kernel).
    return (x + pe_table[:, : x.shape[1], :]).astype(x.dtype)


if __name__ == "__main__":
    key = jax.random.PRNGKey(0)

    # Case 1: module-consistent small shapes (batch=2, seq=8, d_model=32), f32.
    # D=32 < 128 -> lane-dense flattened Path B (lane axis = S*D = 256), PE slab cached.
    B, S, D = 2, 8, 32
    module = PositionalEncoding(D, max_len=64)
    x = jax.random.normal(key, (B, S, D), dtype=jnp.float32)
    out = jax.block_until_ready(module(x))
    ref = reference_forward(x, module.positional_encoding)
    assert out.shape == (B, S, D) and out.dtype == jnp.float32
    assert jnp.allclose(out, ref, atol=1e-6, rtol=1e-6)
    out_b = jax.block_until_ready(module(x))        # second call hits the cached PE slab
    assert jnp.allclose(out_b, ref, atol=1e-6, rtol=1e-6)

    # Case 2: D multiple of 128, bf16 activations -> Path A (batch folded into block),
    # f32 PE table fed directly, single in-kernel cast.
    B2, S2, D2 = 2, 16, 128
    module2 = PositionalEncoding(D2, max_len=32)
    x2 = jax.random.normal(jax.random.PRNGKey(1), (B2, S2, D2), dtype=jnp.bfloat16)
    out2 = jax.block_until_ready(module2(x2))
    ref2 = reference_forward(x2, module2.positional_encoding)
    assert out2.shape == (B2, S2, D2) and out2.dtype == jnp.bfloat16
    assert jnp.allclose(out2.astype(jnp.float32), ref2.astype(jnp.float32),
                        atol=1e-2, rtol=1e-2)

    # Case 3: no lane-dense factorization (D=36, S*D not a multiple of 128) -> tiled Path C.
    B3, S3, D3 = 2, 8, 36
    module3 = PositionalEncoding(D3, max_len=16)
    x3 = jax.random.normal(jax.random.PRNGKey(2), (B3, S3, D3), dtype=jnp.float32)
    out3 = jax.block_until_ready(module3(x3))
    ref3 = reference_forward(x3, module3.positional_encoding)
    assert out3.shape == (B3, S3, D3) and out3.dtype == jnp.float32
    assert jnp.allclose(out3, ref3, atol=1e-6, rtol=1e-6)

    print("KERNEL_OK")
</pallas_src>

<mosaic_0001>
module attributes {stable_mosaic.version = 11 : i64} {
  func.func @_add_pe_kernel(%arg0: i32, %arg1: i32, %arg2: memref<2x256xf32, #tpu.memory_space<vmem>>, %arg3: memref<1x256xf32, #tpu.memory_space<vmem>>, %arg4: memref<2x256xf32, #tpu.memory_space<vmem>>) attributes {dimension_semantics = [#tpu.dimension_semantics<parallel>, #tpu.dimension_semantics<parallel>], iteration_bounds = array<i64: 1, 1>, scalar_prefetch = 0 : i64, scratch_operands = 0 : i64, tpu.core_type = #tpu.core_type<tc>, window_params = [{transform_indices = @transform_0, window_bounds = array<i64: 2, 256>}, {transform_indices = @transform_1, window_bounds = array<i64: 1, 256>}, {transform_indices = @transform_2, window_bounds = array<i64: 2, 256>}]} {
    %c0 = arith.constant 0 : index
    %c0_0 = arith.constant 0 : index
    %0 = vector.load %arg2[%c0, %c0_0] : memref<2x256xf32, #tpu.memory_space<vmem>>, vector<2x256xf32>
    %c0_1 = arith.constant 0 : index
    %c0_2 = arith.constant 0 : index
    %1 = vector.load %arg3[%c0_1, %c0_2] : memref<1x256xf32, #tpu.memory_space<vmem>>, vector<1x256xf32>
    %2 = vector.broadcast %1 : vector<1x256xf32> to vector<2x256xf32>
    %3 = arith.addf %0, %2 : vector<2x256xf32>
    %c0_3 = arith.constant 0 : index
    %c0_4 = arith.constant 0 : index
    %4 = vector.load %arg4[%c0_3, %c0_4] : memref<2x256xf32, #tpu.memory_space<vmem>>, vector<2x256xf32>
    tpu.vector_store %arg4[%c0_3, %c0_4], %3 {strides = array<i32>} : memref<2x256xf32, #tpu.memory_space<vmem>>, vector<2x256xf32>,
    return
  }
  func.func @transform_0(%arg0: i32, %arg1: i32) -> (i32, i32) {
    %c0_i32 = arith.constant 0 : i32
    return %arg1, %arg0 : i32, i32
  }
  func.func @transform_1(%arg0: i32, %arg1: i32) -> (i32, i32) {
    %c0_i32 = arith.constant 0 : i32
    %c0_i32_0 = arith.constant 0 : i32
    return %c0_i32, %arg0 : i32, i32
  }
  func.func @transform_2(%arg0: i32, %arg1: i32) -> (i32, i32) {
    %c0_i32 = arith.constant 0 : i32
    return %arg1, %arg0 : i32, i32
  }
}

</mosaic_0001>

<bundles_post_ra>
// kernel: tpu_custom_call.1
= control target key start
LH: loop header
LB: loop body
LE: loop exit
PB: predicated region body
PF: predicated region fallthrough
CT: control target
= control target key end

     0   :  { %7 = vsyncpa [#allocation3], 0  ;;  %s157_s0 = inlined_call_operand.hbm [shape: f32[2,256], index: 0, kind: input, shape index: {}]   ;;  %s158_s1 = inlined_call_operand.vmem [shape: f32[1,256], index: 1, kind: input, shape index: {}]   ;;  %s159_s2 = inlined_call_operand.hbm [shape: f32[2,256], index: 2, kind: output, shape index: {}]  }
   0x1   :  { %8 = vsyncpa [#allocation4], 0  ;;  %s112_s9 = smov [#allocation2]   ;;  %s64_s13 = scalar_lea.hbm %s157_s0, 64 }
   0x2   :  { %s15_s10 = sshll.u32 %s112_s9, 4  ;;  %p65_p0 = scmp.ne.s32.totalorder %s157_s0, %s64_s13  ;;  %s16_s10 = int_to_ptr.vmem [resolvable:$true] %s15_s10 }
   0x3   :  { %p68_p1 = scmp.lt.u32.totalorder %s64_s13, %s157_s0 }
   0x5   :  { %p70_p2 = pnand %p68_p1, %p65_p0 }
   0x7   :  { %73 = shalt.err (!%p70_p2)
}
   0x8   :  { %s74_s18 = scalar_lea.vmem %s16_s10, 64  ;;  %p79_p4 = scmp.lt.s32.totalorder %s16_s10, %s16_s10 }
   0x9   :  { %p75_p3 = scmp.ne.s32.totalorder %s16_s10, %s74_s18  ;;  %p80_p5 = scmp.lt.s32.totalorder %s74_s18, %s74_s18 }
   0xb   :  { %p81_p6 = por %p80_p5, %p79_p4 }
   0xd   :  { %p82_p7 = pnand %p81_p6, %p75_p3 }
   0xf   :  { %85 = shalt.err (!%p82_p7)
}
  0x10   :  { %18 = dma.hbm_to_vmem [thread:$0]  %s157_s0, 64, %s16_s10, [#allocation3]  }
  0x11   :  { %108 = dma.done.wait [#allocation3], 64  }
  0x12   :  { %109 = vsyncadd [#allocation3], 4294967232  ;;  %v27_v0 = vlaneseq  ;;  %v113_v1 = vmov 1983009808   ;;  %v25_v7 = vld [vmem:[%s158_s1] sm:$0x3] }
  0x13   :  { %v37_v2 = vunpack.c.l.s4 %v113_v1  ;;  %v24_v12 = vld [vmem:[#allocation2] sm:$0xf]  ;;  %s114_s23 = smov [#allocation5]  }
  0x14   :  { %v28_v3 = vshrl.u32 %v27_v0, 7  ;;  %s52_s0 = sshll.u32 %s114_s23, 4  ;;  %s53_s0 = int_to_ptr.vmem [resolvable:$true] %s52_s0 }
  0x15   :  { %v38_v6 = vunpack.c.0.s8 %v37_v2  ;;  %s86_s24 = scalar_lea.vmem %s53_s0, 64  ;;  %p91_p9 = scmp.lt.s32.totalorder %s53_s0, %s53_s0 }
  0x16   :  { %v29_v4 = vsub.s32 0, %v28_v3  ;;  %v33_v5 = vsub.s32 1, %v28_v3  ;;  %p87_p8 = scmp.ne.s32.totalorder %s53_s0, %s86_s24  ;;  %p92_p10 = scmp.lt.s32.totalorder %s86_s24, %s86_s24 }
  0x17   :  { %v41_v10 = vsub.s32 %v38_v6, %v28_v3 }
  0x18   :  { %v30_v8 = vrot.slane %v25_v7, %v29_v4  ;;  %v34_v9 = vrot.slane %v25_v7, %v33_v5  ;;  %p93_p11 = por %p92_p10, %p91_p9 }
  0x1a   :  { %v35_v11 = vcombine.low %v30_v8, %v34_v9  ;;  %p94_p12 = pnand %p93_p11, %p87_p8 }
  0x1c   :  { %v42_v13 = vrot.slane %v35_v11, %v41_v10 }
  0x1e   :  { %v44_v14 = vadd.f32 %v42_v13, %v24_v12 }
  0x20   :  { %45 = vst [vmem:[#allocation5] sm:$0xf] %v44_v14 }
  0x21   :  { %97 = shalt.err (!%p94_p12)
}
  0x22   :  { %s98_s26 = scalar_lea.hbm %s159_s2, 64 }
  0x23   :  { %p99_p13 = scmp.ne.s32.totalorder %s159_s2, %s98_s26  ;;  %p102_p0 = scmp.lt.u32.totalorder %s98_s26, %s159_s2 }
  0x25   :  { %p104_p1 = pnand %p102_p0, %p99_p13 }
  0x27   :  { %107 = shalt.err (!%p104_p1)
}
  0x28   :  { %55 = dma.vmem_to_hbm [thread:$0]  %s53_s0, 64, %s159_s2, [#allocation4]  }
  0x29   :  { %110 = dma.done.wait [#allocation4], 64  }
  0x2a   :  { %111 = vsyncadd [#allocation4], 4294967232 }
  0x2b   :  { %59 = vsyncpa [#allocation3], 1 }
  0x2c   :  { %60 = vsyncpa [#allocation4], 1 }

</bundles_post_ra>
